<compile_context>
chip_gen: v7x
topology: tpu7x:2x2x1
jax: 0.10.0
libtpu: 0.0.40
codegen_flags: <defaults>
</compile_context>

<pallas_src>
import jax
import jax.numpy as jnp
from jax import lax
from jax.experimental import pallas as pl
from jax.experimental.pallas import tpu as pltpu

EPS = 1e-12  # F.normalize default eps (clamp_min on the L2 norm)


def cosine_lora_kernel(x_ref, b_ref, scale_ref, out_ref):
    x = x_ref[...].astype(jnp.float32)          # (TB, D)
    b = b_ref[...].astype(jnp.float32)          # (1, D)   resident across grid

    # Raw projection onto B and squared row norm of x (no scaled copy of x).
    dot = jnp.sum(x * b, axis=1, keepdims=True)   # (TB, 1)
    ssq = jnp.sum(x * x, axis=1, keepdims=True)   # (TB, 1)

    # 1 / max(||x||, eps) == rsqrt(max(||x||^2, eps^2))  -> EUP slot, no divide.
    inv_xn = lax.rsqrt(jnp.maximum(ssq, jnp.float32(EPS * EPS)))

    # Fold per-class scale (sigma, sign/|a|, 1/||B||) into the tiny output.
    out = (dot * inv_xn) * scale_ref[...]         # (TB,1) * (1,C) -> (TB, C)
    out_ref[...] = out.astype(out_ref.dtype)


def _choose_tile_b(batch, in_features, itemsize):
    """Pick a batch tile: multiple of 8, many grid steps, and keep the
    double-buffered x tile within ~16 MiB so default scoped VMEM works on
    v5e (16 MiB), v6e (32 MiB) and v7x (32 of 64 MiB)."""
    budget = 16 * 1024 * 1024
    cap = budget // max(1, 2 * in_features * itemsize)
    cap = max(8, min(1024, cap))
    cap = (cap // 8) * 8
    if batch <= cap:
        return batch
    for t in range(cap, 0, -8):
        if batch % t == 0:
            return t
    return batch  # fallback: single tile (rare, odd batch sizes)


def cosine_lora_classifier(x, A, B, sigma=None, *, tile_b=None):
    """x: (batch, in_features); A: (n_classes, 1); B: (1, in_features);
    sigma: scalar-like or None (module built with sigma=False)."""
    batch, in_features = x.shape
    n_classes = A.shape[0]

    # ---- weight-side work, hoisted out of the per-tile kernel body ----
    sig = (jnp.float32(1.0) if sigma is None
           else jnp.asarray(sigma, jnp.float32).reshape(()))
    a = A[:, 0].astype(jnp.float32)                           # (C,)
    b_norm = jnp.sqrt(jnp.sum(B.astype(jnp.float32) ** 2))    # ||B||_2 (dim=1)
    # Exact F.normalize(weight, dim=1) semantics folded into a per-class scalar.
    row_scale = (sig * a / jnp.maximum(jnp.abs(a) * b_norm, EPS))
    row_scale = row_scale.reshape(1, n_classes)

    if tile_b is None:
        tile_b = _choose_tile_b(batch, in_features,
                                jnp.dtype(x.dtype).itemsize)
    assert batch % tile_b == 0, (batch, tile_b)
    grid = (batch // tile_b,)

    itemsize = jnp.dtype(x.dtype).itemsize
    cost = pl.CostEstimate(
        flops=4 * batch * in_features + 3 * batch * n_classes,
        transcendentals=batch,
        bytes_accessed=(batch * in_features * itemsize
                        + in_features * 4 + n_classes * 4
                        + batch * n_classes * itemsize),
    )

    return pl.pallas_call(
        cosine_lora_kernel,
        out_shape=jax.ShapeDtypeStruct((batch, n_classes), x.dtype),
        grid_spec=pltpu.PrefetchScalarGridSpec(
            num_scalar_prefetch=0,
            grid=grid,
            in_specs=[
                pl.BlockSpec((tile_b, in_features), lambda i: (i, 0)),
                pl.BlockSpec((1, in_features), lambda i: (0, 0)),
                pl.BlockSpec((1, n_classes), lambda i: (0, 0)),
            ],
            out_specs=pl.BlockSpec((tile_b, n_classes), lambda i: (i, 0)),
        ),
        compiler_params=pltpu.CompilerParams(
            dimension_semantics=("parallel",),     # shards grid over v7x's 2 TCs
            vmem_limit_bytes=32 * 1024 * 1024,     # safe on v5e/v6e/v7x; tile fits
        ),
        cost_estimate=cost,
    )(x, B, row_scale)


def reference(x, A, B, sigma):
    """Direct transcription of the PyTorch forward."""
    w = A @ B
    xn = x / jnp.maximum(
        jnp.sqrt(jnp.sum(x * x, axis=1, keepdims=True)), EPS)
    wn = w / jnp.maximum(
        jnp.sqrt(jnp.sum(w * w, axis=1, keepdims=True)), EPS)
    out = xn @ wn.T
    if sigma is not None:
        out = jnp.asarray(sigma, jnp.float32).reshape(()) * out
    return out


if __name__ == "__main__":
    # Small shapes consistent with the module.
    batch, in_features, n_classes = 8, 128, 16

    key = jax.random.PRNGKey(0)
    kx, ka, kb = jax.random.split(key, 3)

    x = jax.random.normal(kx, (batch, in_features), dtype=jnp.float32)

    # kaiming_normal_(nonlinearity='linear'): std = 1/sqrt(fan_in).
    A = jax.random.normal(ka, (n_classes, 1), dtype=jnp.float32)       # fan_in=1
    B = jax.random.normal(kb, (1, in_features), dtype=jnp.float32) / jnp.sqrt(
        jnp.float32(in_features))                                      # fan_in=D
    sigma = jnp.ones((1,), dtype=jnp.float32)   # sigma=True path (init to 1)

    out = cosine_lora_classifier(x, A, B, sigma)
    out = jax.block_until_ready(out)

    ref = reference(x, A, B, sigma)
    assert out.shape == (batch, n_classes)
    assert jnp.allclose(out, ref, atol=1e-5, rtol=1e-5), (
        float(jnp.max(jnp.abs(out - ref))))

    print("KERNEL_OK")
</pallas_src>

<mosaic_0001>
module attributes {stable_mosaic.version = 11 : i64} {
  func.func @cosine_lora_kernel(%arg0: i32, %arg1: memref<8x128xf32, #tpu.memory_space<vmem>>, %arg2: memref<1x128xf32, #tpu.memory_space<vmem>>, %arg3: memref<1x16xf32, #tpu.memory_space<vmem>>, %arg4: memref<8x16xf32, #tpu.memory_space<vmem>>) attributes {dimension_semantics = [#tpu.dimension_semantics<parallel>], iteration_bounds = array<i64: 1>, scalar_prefetch = 0 : i64, scratch_operands = 0 : i64, tpu.core_type = #tpu.core_type<tc>, window_params = [{transform_indices = @transform_0, window_bounds = array<i64: 8, 128>}, {pipeline_mode = #tpu.pipeline_mode<synchronous>, transform_indices = @transform_1, window_bounds = array<i64: 1, 128>}, {pipeline_mode = #tpu.pipeline_mode<synchronous>, transform_indices = @transform_2, window_bounds = array<i64: 1, 16>}, {transform_indices = @transform_3, window_bounds = array<i64: 8, 16>}]} {
    %c0 = arith.constant 0 : index
    %c0_0 = arith.constant 0 : index
    %0 = vector.load %arg1[%c0, %c0_0] : memref<8x128xf32, #tpu.memory_space<vmem>>, vector<8x128xf32>
    %c0_1 = arith.constant 0 : index
    %c0_2 = arith.constant 0 : index
    %1 = vector.load %arg2[%c0_1, %c0_2] : memref<1x128xf32, #tpu.memory_space<vmem>>, vector<1x128xf32>
    %2 = vector.broadcast %1 : vector<1x128xf32> to vector<8x128xf32>
    %3 = arith.mulf %0, %2 : vector<8x128xf32>
    %cst = arith.constant dense<0.000000e+00> : vector<8xf32>
    %4 = vector.multi_reduction <add>, %3, %cst [1] : vector<8x128xf32> to vector<8xf32>
    %5 = vector.shape_cast %4 : vector<8xf32> to vector<8x1xf32>
    %6 = arith.mulf %0, %0 : vector<8x128xf32>
    %cst_3 = arith.constant dense<0.000000e+00> : vector<8xf32>
    %7 = vector.multi_reduction <add>, %6, %cst_3 [1] : vector<8x128xf32> to vector<8xf32>
    %8 = vector.shape_cast %7 : vector<8xf32> to vector<8x1xf32>
    %cst_4 = arith.constant 1.000000e-24 : f32
    %9 = vector.broadcast %cst_4 : f32 to vector<8x1xf32>
    %10 = arith.maximumf %8, %9 : vector<8x1xf32>
    %11 = math.rsqrt %10 : vector<8x1xf32>
    %12 = arith.mulf %5, %11 : vector<8x1xf32>
    %c0_5 = arith.constant 0 : index
    %c0_6 = arith.constant 0 : index
    %13 = vector.load %arg3[%c0_5, %c0_6] : memref<1x16xf32, #tpu.memory_space<vmem>>, vector<1x16xf32>
    %14 = vector.broadcast %12 : vector<8x1xf32> to vector<8x16xf32>
    %15 = vector.broadcast %13 : vector<1x16xf32> to vector<8x16xf32>
    %16 = arith.mulf %14, %15 : vector<8x16xf32>
    %c0_7 = arith.constant 0 : index
    %c0_8 = arith.constant 0 : index
    %17 = vector.load %arg4[%c0_7, %c0_8] : memref<8x16xf32, #tpu.memory_space<vmem>>, vector<8x16xf32>
    tpu.vector_store %arg4[%c0_7, %c0_8], %16 {strides = array<i32>} : memref<8x16xf32, #tpu.memory_space<vmem>>, vector<8x16xf32>,
    return
  }
  func.func @transform_0(%arg0: i32) -> (i32, i32) {
    %c0_i32 = arith.constant 0 : i32
    %c0_i32_0 = arith.constant 0 : i32
    return %arg0, %c0_i32 : i32, i32
  }
  func.func @transform_1(%arg0: i32) -> (i32, i32) {
    %c0_i32 = arith.constant 0 : i32
    %c0_i32_0 = arith.constant 0 : i32
    %c0_i32_1 = arith.constant 0 : i32
    return %c0_i32, %c0_i32_0 : i32, i32
  }
  func.func @transform_2(%arg0: i32) -> (i32, i32) {
    %c0_i32 = arith.constant 0 : i32
    %c0_i32_0 = arith.constant 0 : i32
    %c0_i32_1 = arith.constant 0 : i32
    return %c0_i32, %c0_i32_0 : i32, i32
  }
  func.func @transform_3(%arg0: i32) -> (i32, i32) {
    %c0_i32 = arith.constant 0 : i32
    %c0_i32_0 = arith.constant 0 : i32
    return %arg0, %c0_i32 : i32, i32
  }
}

</mosaic_0001>

<bundles_post_ra>
// kernel: tpu_custom_call.1
= control target key start
LH: loop header
LB: loop body
LE: loop exit
PB: predicated region body
PF: predicated region fallthrough
CT: control target
= control target key end

     0   :  { %8 = vsyncpa [#allocation3], 0  ;;  %s175_s0 = inlined_call_operand.hbm [shape: f32[8,128], index: 0, kind: input, shape index: {}]   ;;  %s176_s1 = inlined_call_operand.vmem [shape: f32[1,128], index: 1, kind: input, shape index: {}]   ;;  %s177_s2 = inlined_call_operand.vmem [shape: f32[1,16], index: 2, kind: input, shape index: {}]   ;;  %s178_s3 = inlined_call_operand.hbm [shape: f32[8,16], index: 3, kind: output, shape index: {}]  }
   0x1   :  { %9 = vsyncpa [#allocation4], 0  ;;  %s123_s12 = smov [#allocation2]   ;;  %s75_s16 = scalar_lea.hbm %s175_s0, 128 }
   0x2   :  { %s16_s13 = sshll.u32 %s123_s12, 4  ;;  %p76_p0 = scmp.ne.s32.totalorder %s175_s0, %s75_s16  ;;  %s17_s13 = int_to_ptr.vmem [resolvable:$true] %s16_s13 }
   0x3   :  { %p79_p1 = scmp.lt.u32.totalorder %s75_s16, %s175_s0 }
   0x5   :  { %p81_p2 = pnand %p79_p1, %p76_p0 }
   0x7   :  { %84 = shalt.err (!%p81_p2)
}
   0x8   :  { %s85_s21 = scalar_lea.vmem %s17_s13, 128  ;;  %p90_p4 = scmp.lt.s32.totalorder %s17_s13, %s17_s13 }
   0x9   :  { %p86_p3 = scmp.ne.s32.totalorder %s17_s13, %s85_s21  ;;  %p91_p5 = scmp.lt.s32.totalorder %s85_s21, %s85_s21 }
   0xb   :  { %p92_p6 = por %p91_p5, %p90_p4 }
   0xd   :  { %p93_p7 = pnand %p92_p6, %p86_p3 }
   0xf   :  { %96 = shalt.err (!%p93_p7)
}
  0x10   :  { %19 = dma.hbm_to_vmem [thread:$0]  %s175_s0, 128, %s17_s13, [#allocation3]  }
  0x11   :  { %119 = dma.done.wait [#allocation3], 128  }
  0x12   :  { %120 = vsyncadd [#allocation3], 4294967168  ;;  %v27_v0 = vld [vmem:[#allocation2] sm:$0xff]  ;;  %s124_s0 = smov [#allocation5]   ;;  %vm52_vm0 = vcmask 130048  }
  0x13   :  { %v69_v1 = vld [vmem:[%s176_s1] ss:$0 sm:$0xff]  ;;  %v38_v2 = vmul.f32 %v27_v0, %v27_v0  ;;  %s60_s28 = sshll.u32 %s124_s0, 4  ;;  %s61_s28 = int_to_ptr.vmem [resolvable:$true] %s60_s28 }
  0x14   :  { %v35_v3 = vmul.f32 %v69_v1, %v27_v0  ;;  %v70_v8 = vld [vmem:[%s177_s2] ss:$0 sm:$0xff]  ;;  %s97_s1 = scalar_lea.vmem %s61_s28, 128  ;;  %p102_p9 = scmp.lt.s32.totalorder %s61_s28, %s61_s28 }
  0x15   :  { %39 = vadd.xlane.f32.xlu0 %v38_v2  ;;  %p98_p8 = scmp.ne.s32.totalorder %s61_s28, %s97_s1  ;;  %p103_p10 = scmp.lt.s32.totalorder %s97_s1, %s97_s1 }
  0x17   :  { %p104_p11 = por %p103_p10, %p102_p9 }
  0x19   :  { %36 = vadd.xlane.f32.xlu0 %v35_v3  ;;  %p105_p12 = pnand %p104_p11, %p98_p8 }
  0xa2   :  { %v40_v4 = vpop.xlane.xlu0 %39 }
  0xa3   :  { %v41_v5 = vmax.f32 %v40_v4, 1e-24 }
  0xa5   :  { %73 = vrsqrt.f32 %v41_v5 }
  0xa6   :  { %v37_v6 = vpop.xlane.xlu0 %36 }
  0xaf   :  { %v74_v7 = vpop.eup %73 }
  0xb0   :  { %v43_v9 = vmul.f32 %v74_v7, %v37_v6 }
  0xb2   :  { %v51_v10 = vmul.f32 %v70_v8, %v43_v9 }
  0xb4   :  { %53 = vst.msk [vmem:[#allocation5] sm:$0xff] %vm52_vm0, %v51_v10 }
  0xb5   :  { %108 = shalt.err (!%p105_p12)
}
  0xb6   :  { %s109_s4 = scalar_lea.hbm %s178_s3, 128 }
  0xb7   :  { %p110_p13 = scmp.ne.s32.totalorder %s178_s3, %s109_s4  ;;  %p113_p0 = scmp.lt.u32.totalorder %s109_s4, %s178_s3 }
  0xb9   :  { %p115_p1 = pnand %p113_p0, %p110_p13 }
  0xbb   :  { %118 = shalt.err (!%p115_p1)
}
  0xbc   :  { %63 = dma.vmem_to_hbm [thread:$0]  %s61_s28, 128, %s178_s3, [#allocation4]  }
  0xbd   :  { %121 = dma.done.wait [#allocation4], 128  }
  0xbe   :  { %122 = vsyncadd [#allocation4], 4294967168 }
  0xbf   :  { %67 = vsyncpa [#allocation3], 1 }
  0xc0   :  { %68 = vsyncpa [#allocation4], 1 }

</bundles_post_ra>
